<compile_context>
chip_gen: v7x
topology: tpu7x:2x2x1
jax: 0.10.0
libtpu: 0.0.40
codegen_flags: <defaults>
</compile_context>

<pallas_src>
import jax
import jax.numpy as jnp
from jax import lax
from jax.experimental import pallas as pl
from jax.experimental.pallas import tpu as pltpu

# ---- synthetic config (small shapes) ----------------------------------------
H = W = 16              # spatial
C_IN = 3                # RGB image channels
KH = KW = 3             # conv kernel
K_TAPS = KH * KW * C_IN          # 27 im2col taps, ordered (c, dy, dx)
K_AUG = K_TAPS + 1               # +1 ones row carrying the folded conv bias
N_FEATURES = 32         # backbone classifier.in_features (scaled down)
TARGET_SIZE = 5         # cfg.target_size


def custom_model_kernel(patchesT_ref, blob_ref, outT_ref):
    """Whole forward pass in one invocation (all operands resident in VMEM).

    patchesT_ref: (K_AUG, B*H*W) bf16  im2col patches + ones row, lane-dense
    blob_ref    : (F+T, F+1)     bf16  packed constants:
                    [0:F,   0:K_AUG]  conv weight^T with bconv folded in col 27
                    [F:F+T, 0:F]      fc weight^T pre-scaled by 1/(H*W)
                    [F:F+T, F:F+1]    fc bias (column)
    outT_ref    : (T, B)         f32
    """
    m_total = patchesT_ref.shape[1]
    hw = H * W
    batch = m_total // hw

    # 3x3 SAME conv (+ folded bias) as ONE bf16 MXU push; lane-dense (F, B*H*W).
    acc = jnp.dot(blob_ref[0:N_FEATURES, 0:K_AUG], patchesT_ref[...],
                  preferred_element_type=jnp.float32)

    # Exact SiLU in f32 (EUP exp + divide); no approx reciprocal, v5e-safe.
    acc = acc / (1.0 + jnp.exp(-acc))

    # fc applied BEFORE the (linear) global-average pool: second MXU push.
    # The 1/(H*W) mean scale is pre-folded into the packed fc weight.
    tmp = jnp.dot(blob_ref[N_FEATURES:N_FEATURES + TARGET_SIZE, 0:N_FEATURES],
                  acc.astype(jnp.bfloat16),
                  preferred_element_type=jnp.float32)              # (T, B*H*W)

    bfc = blob_ref[N_FEATURES:N_FEATURES + TARGET_SIZE,
                   N_FEATURES:N_FEATURES + 1].astype(jnp.float32)  # (T, 1)

    # GAP as per-batch lane-group sums over the contiguous H*W lane blocks
    # (static unroll, B is tiny).
    for b in range(batch):
        outT_ref[:, b:b + 1] = (
            jnp.sum(tmp[:, b * hw:(b + 1) * hw], axis=-1, keepdims=True) + bfc
        ).astype(outT_ref.dtype)


def init_params(key):
    """Synthetic parameters.

    wconv rows are ordered (c, dy, dx); to import a real PyTorch Conv2d weight
    of shape (F, C, KH, KW) use w.permute(1, 2, 3, 0).reshape(C*KH*KW, F).
    """
    k1, k2, k3, k4 = jax.random.split(key, 4)
    wconv = jax.random.normal(k1, (K_TAPS, N_FEATURES), jnp.float32) * 0.1
    bconv = jax.random.normal(k2, (N_FEATURES,), jnp.float32) * 0.01
    wfc = jax.random.normal(k3, (N_FEATURES, TARGET_SIZE), jnp.float32) * 0.1
    bfc = jax.random.normal(k4, (TARGET_SIZE,), jnp.float32) * 0.01
    return wconv, bconv, wfc, bfc


def pack_params(params):
    """One-time packing of every constant operand into a single bf16 blob.

    Done outside the per-step jit so no transposes / pads / constant builds
    appear in the forward graph, and the kernel sees exactly 2 operands.
    """
    wconv, bconv, wfc, bfc = params
    wconvT_aug = jnp.concatenate([wconv, bconv[None, :]], axis=0).T   # (F, K_AUG)
    wfcT_scaled = wfc.T / float(H * W)                                # (T, F), GAP mean folded
    blob = jnp.zeros((N_FEATURES + TARGET_SIZE, N_FEATURES + 1), jnp.float32)
    blob = blob.at[0:N_FEATURES, 0:K_AUG].set(wconvT_aug)
    blob = blob.at[N_FEATURES:, 0:N_FEATURES].set(wfcT_scaled)
    blob = blob.at[N_FEATURES:, N_FEATURES].set(bfc)
    return blob.astype(jnp.bfloat16)


def custom_model_forward(image_nchw, blob):
    """image_nchw: (B, C_IN, H, W) float32 (PyTorch layout). blob: pack_params(...)."""
    B = image_nchw.shape[0]
    M = B * H * W

    # im2col in ONE fused XLA conv op; 'CNHW' output layout puts the 27 patch
    # taps (ordered (c, dy, dx)) leading, so no separate wrapper transpose.
    patches = lax.conv_general_dilated_patches(
        image_nchw, (KH, KW), (1, 1), 'SAME',
        dimension_numbers=('NCHW', 'OIHW', 'CNHW'))            # (27, B, H, W)
    patchesT = jnp.concatenate(
        [patches.reshape(K_TAPS, M).astype(jnp.bfloat16),
         jnp.ones((1, M), jnp.bfloat16)],                      # ones row = folded bconv
        axis=0)                                                # (K_AUG, B*H*W)

    vmem = pl.BlockSpec(memory_space=pltpu.MemorySpace.VMEM)
    # Single invocation, no grid: pipeline machinery would be pure overhead
    # at this size (see scaling TODO at top of file).
    outT = pl.pallas_call(
        custom_model_kernel,
        out_shape=jax.ShapeDtypeStruct((TARGET_SIZE, B), jnp.float32),
        in_specs=[vmem, vmem],
        out_specs=vmem,
    )(patchesT, blob)
    return outT.T                                              # (B, TARGET_SIZE)


def reference_forward(image_nchw, params):
    """Pure-JAX f32 reference of the same synthetic forward pass."""
    wconv, bconv, wfc, bfc = params
    B = image_nchw.shape[0]
    xp = jnp.pad(image_nchw, ((0, 0), (0, 0), (1, 1), (1, 1)))
    taps = [xp[:, c, dy:dy + H, dx:dx + W]
            for c in range(C_IN) for dy in range(KH) for dx in range(KW)]
    patches = jnp.stack(taps, axis=-1).reshape(B * H * W, K_TAPS)
    acc = patches @ wconv + bconv
    acc = acc / (1.0 + jnp.exp(-acc))                          # SiLU
    feat = acc.reshape(B, H * W, N_FEATURES).mean(axis=1)      # GAP
    return feat @ wfc + bfc


if __name__ == "__main__":
    key = jax.random.PRNGKey(0)
    k_img, k_par = jax.random.split(key)
    image = jax.random.normal(k_img, (2, C_IN, H, W), jnp.float32)  # NCHW, like PyTorch
    params = init_params(k_par)
    blob = pack_params(params)          # one-time constant packing (outside jit)

    out = jax.jit(custom_model_forward)(image, blob)
    out = jax.block_until_ready(out)
    assert out.shape == (2, TARGET_SIZE)

    # Loose tolerance: kernel matmuls intentionally use bf16 inputs (f32 accumulate).
    ref = reference_forward(image, params)
    assert jnp.allclose(out, ref, rtol=1e-1, atol=3e-2)
    print("KERNEL_OK")
</pallas_src>

<mosaic_0001>
module attributes {stable_mosaic.version = 11 : i64} {
  func.func @custom_model_kernel(%arg0: memref<28x512xbf16, #tpu.memory_space<vmem>>, %arg1: memref<37x33xbf16, #tpu.memory_space<vmem>>, %arg2: memref<5x2xf32, #tpu.memory_space<vmem>>) attributes {dimension_semantics = [], scalar_prefetch = 0 : i64, scratch_operands = 0 : i64, tpu.core_type = #tpu.core_type<tc>} {
    %c0 = arith.constant 0 : index
    %c0_0 = arith.constant 0 : index
    %0 = vector.load %arg1[%c0, %c0_0] : memref<37x33xbf16, #tpu.memory_space<vmem>>, vector<32x28xbf16>
    %c0_1 = arith.constant 0 : index
    %c0_2 = arith.constant 0 : index
    %1 = vector.load %arg0[%c0_1, %c0_2] : memref<28x512xbf16, #tpu.memory_space<vmem>>, vector<28x512xbf16>
    %cst = arith.constant dense<0.000000e+00> : vector<32x512xf32>
    %2 = tpu.matmul %0, %1, %cst {dimension_numbers = #tpu.dot_dimension_numbers<[1], [0], [0], [1], [0, 0, 1, 1], [], []>} : vector<32x28xbf16>, vector<28x512xbf16>, vector<32x512xf32> -> vector<32x512xf32>
    %cst_3 = arith.constant 0.000000e+00 : f32
    %3 = vector.broadcast %cst_3 : f32 to vector<32x512xf32>
    %4 = arith.subf %3, %2 : vector<32x512xf32>
    %5 = math.exp %4 : vector<32x512xf32>
    %cst_4 = arith.constant 1.000000e+00 : f32
    %6 = vector.broadcast %cst_4 : f32 to vector<32x512xf32>
    %7 = arith.addf %6, %5 : vector<32x512xf32>
    %8 = arith.divf %2, %7 : vector<32x512xf32>
    %c32 = arith.constant 32 : index
    %c0_5 = arith.constant 0 : index
    %9 = vector.load %arg1[%c32, %c0_5] : memref<37x33xbf16, #tpu.memory_space<vmem>>, vector<5x32xbf16>
    %10 = arith.truncf %8 : vector<32x512xf32> to vector<32x512xbf16>
    %cst_6 = arith.constant dense<0.000000e+00> : vector<5x512xf32>
    %11 = tpu.matmul %9, %10, %cst_6 {dimension_numbers = #tpu.dot_dimension_numbers<[1], [0], [0], [1], [0, 0, 1, 1], [], []>} : vector<5x32xbf16>, vector<32x512xbf16>, vector<5x512xf32> -> vector<5x512xf32>
    %c32_7 = arith.constant 32 : index
    %c32_8 = arith.constant 32 : index
    %12 = vector.load %arg1[%c32_7, %c32_8] : memref<37x33xbf16, #tpu.memory_space<vmem>>, vector<5x1xbf16>
    %13 = arith.extf %12 : vector<5x1xbf16> to vector<5x1xf32>
    %14 = vector.extract_strided_slice %11 {offsets = [0, 0], sizes = [5, 256], strides = [1, 1]} : vector<5x512xf32> to vector<5x256xf32>
    %cst_9 = arith.constant dense<0.000000e+00> : vector<5xf32>
    %15 = vector.multi_reduction <add>, %14, %cst_9 [1] : vector<5x256xf32> to vector<5xf32>
    %16 = vector.shape_cast %15 : vector<5xf32> to vector<5x1xf32>
    %17 = arith.addf %16, %13 : vector<5x1xf32>
    %c0_10 = arith.constant 0 : index
    %c0_11 = arith.constant 0 : index
    %18 = vector.load %arg2[%c0_10, %c0_11] : memref<5x2xf32, #tpu.memory_space<vmem>>, vector<5x1xf32>
    tpu.vector_store %arg2[%c0_10, %c0_11], %17 {strides = array<i32>} : memref<5x2xf32, #tpu.memory_space<vmem>>, vector<5x1xf32>,
    %19 = vector.extract_strided_slice %11 {offsets = [0, 256], sizes = [5, 256], strides = [1, 1]} : vector<5x512xf32> to vector<5x256xf32>
    %cst_12 = arith.constant dense<0.000000e+00> : vector<5xf32>
    %20 = vector.multi_reduction <add>, %19, %cst_12 [1] : vector<5x256xf32> to vector<5xf32>
    %21 = vector.shape_cast %20 : vector<5xf32> to vector<5x1xf32>
    %22 = arith.addf %21, %13 : vector<5x1xf32>
    %c0_13 = arith.constant 0 : index
    %c1 = arith.constant 1 : index
    %23 = vector.load %arg2[%c0_13, %c1] : memref<5x2xf32, #tpu.memory_space<vmem>>, vector<5x1xf32>
    tpu.vector_store %arg2[%c0_13, %c1], %22 {strides = array<i32>} : memref<5x2xf32, #tpu.memory_space<vmem>>, vector<5x1xf32>,
    return
  }
}

</mosaic_0001>

<bundles_post_ra>
// kernel: custom_model_forward.1
= control target key start
LH: loop header
LB: loop body
LE: loop exit
PB: predicated region body
PF: predicated region fallthrough
CT: control target
= control target key end

     0   :  { %v516_v1 = vmov 0   ;;  %vm77_vm0 = vcmask 1045504   ;;  %vm70_vm1 = vcmask 228352   ;;  %vm301_vm2 = vcmask 261120   ;;  %s518_s30 = smov 97   ;;  %s637_s0 = inlined_call_operand.vmem [shape: bf16[28,512], index: 0, kind: input, shape index: {}]   ;;  %s638_s1 = inlined_call_operand.vmem [shape: bf16[37,33], index: 1, kind: input, shape index: {}]   ;;  %s639_s2 = inlined_call_operand.vmem [shape: f32[5,2], index: 2, kind: output, shape index: {}]  }
   0x1   :  { %v438_v0 = vld [vmem:[%s637_s0 + $0x4] ss:$16 sps:$4 sm:$0xff]   ;;  %122 = vmatprep.mubr.bf16.mxu0 %v516_v1  ;;  %175 = vmatprep.mubr.bf16.mxu1 %v516_v1  ;;  %v440_v2 = vld [vmem:[%s637_s0 + $0xc] ss:$16 sps:$4 sm:$0xff]   ;;  %v442_v3 = vld [vmem:[%s637_s0] ss:$16 sps:$4 sm:$0xff]  }
   0x2   :  { %90 = vmatprep.subr.bf16.mxu0 %v438_v0  ;;  %v443_v4 = vld [vmem:[%s637_s0 + $0x8] ss:$16 sps:$4 sm:$0xff]   ;;  %143 = vmatprep.subr.bf16.mxu1 %v440_v2  ;;  %v444_v5 = vld [vmem:[%s637_s0 + $0x24] ss:$16 sps:$4 sm:$0x3f]   ;;  %vm388_vm3 = vcmask 1044480  }
   0x3   :  { %91 = vmatpush1.bf16.msra.mxu0 %v442_v3  ;;  %144 = vmatpush1.bf16.msra.mxu1 %v443_v4  ;;  %v446_v6 = vld [vmem:[%s637_s0 + $0x2c] ss:$16 sps:$4 sm:$0x3f]   ;;  %v448_v7 = vld [vmem:[%s637_s0 + $0x20] ss:$16 sps:$4 sm:$0x3f]  }
   0x4   :  { %427 = vmatprep.subr.msk.bf16.mxu0 %vm77_vm0, %v444_v5  ;;  %v449_v8 = vld [vmem:[%s637_s0 + $0x28] ss:$16 sps:$4 sm:$0x3f]   ;;  %430 = vmatprep.subr.msk.bf16.mxu1 %vm77_vm0, %v446_v6  ;;  %v79_v9 = vsel %vm77_vm0, %v448_v7, 0  ;;  %v450_v11 = vld [vmem:[%s638_s1] sm:$0xff]   ;;  %vm399_vm4 = vcmask 4096  }
   0x5   :  { %v85_v10 = vsel %vm77_vm0, %v449_v8, 0  ;;  %v451_v12 = vld [vmem:[%s638_s1 + $0x8] sm:$0xff]   ;;  %vm411_vm5 = vcmask 12296  }
   0x7   :  { %93 = vmatpush1.bf16.msra.mxu0 %v79_v9  ;;  %146 = vmatpush1.bf16.msra.mxu1 %v85_v10 }
   0xa   :  { %428 = vmatmul.mubr.msk.bf16.vlgmr.msra.gmra.mrb[0].mxu0 %vm70_vm1, %v450_v11  ;;  %431 = vmatmul.mubr.msk.bf16.vlgmr.msra.gmra.mrb[0].mxu1 %vm70_vm1, %v450_v11 }
   0xb   :  { %132 = vmatprep.mubr.bf16.mxu0 %v516_v1  ;;  %185 = vmatprep.mubr.bf16.mxu1 %v516_v1 }
  0x12   :  { %429 = vmatmul.mubr.msk.bf16.gmra.mrb[4].mxu0 %vm70_vm1, %v451_v12  ;;  %432 = vmatmul.mubr.msk.bf16.gmra.mrb[4].mxu1 %vm70_vm1, %v451_v12 }
  0x13   :  { %337 = vmatprep.mubr.bf16.mxu0 %v516_v1  ;;  %378 = vmatprep.mubr.bf16.mxu1 %v516_v1 }
  0xdd   :  { %v564_v13 = vpop.f32.mrb[0].mxu0  ;;  %v566_v14 = vpop.f32.mrb[0].mxu1 }
  0xde   :  { %v196_v15 = vsub.f32 0.0, %v564_v13  ;;  %v198_v16 = vsub.f32 0.0, %v566_v14  ;;  %v570_v17 = vpop.f32.mrb[1].mxu0  ;;  %v572_v18 = vpop.f32.mrb[1].mxu1 }
  0xdf   :  { %v197_v19 = vsub.f32 0.0, %v570_v17  ;;  %v199_v20 = vsub.f32 0.0, %v572_v18  ;;  %v576_v21 = vpop.f32.mrb[2].mxu0  ;;  %v578_v22 = vpop.f32.mrb[2].mxu1 }
  0xe0   :  { %v212_v23 = vmul.f32 1.442695, %v196_v15  ;;  %v216_v24 = vmul.f32 1.442695, %v198_v16  ;;  %v200_v25 = vsub.f32 0.0, %v576_v21  ;;  %v202_v26 = vsub.f32 0.0, %v578_v22 }
  0xe1   :  { %v214_v27 = vmul.f32 1.442695, %v197_v19  ;;  %v218_v28 = vmul.f32 1.442695, %v199_v20  ;;  %v582_v29 = vpop.f32.mrb[3].mxu0  ;;  %v584_v30 = vpop.f32.mrb[3].mxu1 }
  0xe2   :  { %452 = vpow2.f32 %v212_v23  ;;  %v220_v31 = vmul.f32 1.442695, %v200_v25  ;;  %v201_v32 = vsub.f32 0.0, %v582_v29  ;;  %v224_v33 = vmul.f32 1.442695, %v202_v26 }
  0xe3   :  { %454 = vpow2.f32 %v216_v24  ;;  %v203_v34 = vsub.f32 0.0, %v584_v30 }
  0xe4   :  { %456 = vpow2.f32 %v214_v27  ;;  %v222_v35 = vmul.f32 1.442695, %v201_v32 }
  0xe5   :  { %458 = vpow2.f32 %v218_v28  ;;  %v226_v36 = vmul.f32 1.442695, %v203_v34  ;;  %v588_v37 = vpop.f32.mrb[4].mxu0  ;;  %v590_v38 = vpop.f32.mrb[4].mxu1 }
  0xe6   :  { %460 = vpow2.f32 %v220_v31  ;;  %v204_v39 = vsub.f32 0.0, %v588_v37  ;;  %v206_v40 = vsub.f32 0.0, %v590_v38  ;;  %v594_v41 = vpop.f32.mrb[5].mxu0  ;;  %v596_v42 = vpop.f32.mrb[5].mxu1 }
  0xe7   :  { %462 = vpow2.f32 %v224_v33  ;;  %v205_v43 = vsub.f32 0.0, %v594_v41  ;;  %v599_v44 = vpop.f32.mrb[6].mxu0  ;;  %v601_v45 = vpop.f32.mrb[6].mxu1  ;;  %v207_v60 = vsub.f32 0.0, %v596_v42 }
  0xe8   :  { %464 = vpow2.f32 %v222_v35  ;;  %v228_v46 = vmul.f32 1.442695, %v204_v39  ;;  %v232_v47 = vmul.f32 1.442695, %v206_v40  ;;  %v208_v48 = vsub.f32 0.0, %v599_v44  ;;  %v604_v49 = vpop.f32.mrb[7].mxu0 }
  0xe9   :  { %466 = vpow2.f32 %v226_v36  ;;  %v230_v50 = vmul.f32 1.442695, %v205_v43  ;;  %v606_v51 = vpop.f32.mrb[7].mxu1  ;;  %v234_v5 = vmul.f32 1.442695, %v207_v60  ;;  %v210_v8 = vsub.f32 0.0, %v601_v45 }
  0xea   :  { %468 = vpow2.f32 %v228_v46  ;;  %v236_v52 = vmul.f32 1.442695, %v208_v48  ;;  %v209_v10 = vsub.f32 0.0, %v604_v49  ;;  %v211_v12 = vsub.f32 0.0, %v606_v51 }
  0xeb   :  { %470 = vpow2.f32 %v232_v47  ;;  %v240_v19 = vmul.f32 1.442695, %v210_v8 }
  0xec   :  { %v453_v53 = vpop.eup %452  ;;  %472 = vpow2.f32 %v230_v50  ;;  %v238_v24 = vmul.f32 1.442695, %v209_v10  ;;  %v242_v26 = vmul.f32 1.442695, %v211_v12 }
  0xed   :  { %v455_v54 = vpop.eup %454  ;;  %v244_v55 = vadd.f32 1.0, %v453_v53  ;;  %474 = vpow2.f32 %v236_v52 }
  0xee   :  { %v457_v56 = vpop.eup %456  ;;  %v246_v57 = vadd.f32 1.0, %v455_v54 }
  0xef   :  { %v459_v58 = vpop.eup %458  ;;  %476 = vrcp.f32 %v244_v55  ;;  %v245_v59 = vadd.f32 1.0, %v457_v56 }
  0xf0   :  { %v461_v61 = vpop.eup %460  ;;  %478 = vrcp.f32 %v246_v57  ;;  %v247_v62 = vadd.f32 1.0, %v459_v58 }
  0xf1   :  { %v463_v63 = vpop.eup %462  ;;  %480 = vrcp.f32 %v245_v59  ;;  %v248_v0 = vadd.f32 1.0, %v461_v61 }
  0xf2   :  { %v465_v1 = vpop.eup %464  ;;  %482 = vrcp.f32 %v247_v62  ;;  %v250_v2 = vadd.f32 1.0, %v463_v63 }
  0xf3   :  { %v467_v3 = vpop.eup %466  ;;  %484 = vrcp.f32 %v248_v0  ;;  %v249_v4 = vadd.f32 1.0, %v465_v1 }
  0xf4   :  { %v469_v6 = vpop.eup %468  ;;  %486 = vrcp.f32 %v250_v2  ;;  %v251_v7 = vadd.f32 1.0, %v467_v3 }
  0xf5   :  { %488 = vrcp.f32 %v249_v4  ;;  %v252_v9 = vadd.f32 1.0, %v469_v6  ;;  %v471_v11 = vpop.eup %470 }
  0xf6   :  { %490 = vrcp.f32 %v251_v7  ;;  %v473_v15 = vpop.eup %472 }
  0xf7   :  { %492 = vpow2.f32 %v234_v5  ;;  %v475_v16 = vpop.eup %474  ;;  %v253_v56 = vadd.f32 1.0, %v473_v15 }
  0xf8   :  { %494 = vrcp.f32 %v252_v9  ;;  %v256_v23 = vadd.f32 1.0, %v475_v16 }
  0xf9   :  { %v477_v20 = vpop.eup %476 }
  0xfa   :  { %v479_v25 = vpop.eup %478  ;;  %496 = vrcp.f32 %v256_v23  ;;  %v261_v33 = vmul.f32 %v477_v20, %v564_v13 }
  0xfb   :  { %v481_v27 = vpop.eup %480  ;;  %498 = vpow2.f32 %v240_v19  ;;  %v265_v36 = vmul.f32 %v479_v25, %v566_v14 }
  0xfc   :  { %v483_v28 = vpop.eup %482  ;;  %500 = vpow2.f32 %v238_v24  ;;  %v263_v43 = vmul.f32 %v481_v27, %v570_v17 }
  0xfd   :  { %v485_v31 = vpop.eup %484  ;;  %502 = vpow2.f32 %v242_v26  ;;  %v267_v50 = vmul.f32 %v483_v28, %v572_v18 }
  0xfe   :  { %v487_v32 = vpop.eup %486  ;;  %v269_v34 = vmul.f32 %v485_v31, %v576_v21  ;;  %v254_v21 = vadd.f32 1.0, %v471_v11 }
  0xff   :  { %v489_v35 = vpop.eup %488  ;;  %v273_v39 = vmul.f32 %v487_v32, %v578_v22 }
 0x100   :  { %v491_v40 = vpop.eup %490  ;;  %v293_v46 = vpack.c.bf16 %v269_v34, %v261_v33  ;;  %v271_v47 = vmul.f32 %v489_v35, %v582_v29  ;;  %504 = vrcp.f32 %v254_v21 }
 0x101   :  { %v493_v48 = vpop.eup %492  ;;  %v295_v52 = vpack.c.bf16 %v273_v39, %v265_v36  ;;  %v275_v13 = vmul.f32 %v491_v40, %v584_v30  ;;  %506 = vrcp.f32 %v253_v56 }
 0x102   :  { %v294_v53 = vpack.c.bf16 %v271_v47, %v263_v43  ;;  %v495_v54 = vpop.eup %494  ;;  %v255_v14 = vadd.f32 1.0, %v493_v48 }
 0x103   :  { %v296_v55 = vpack.c.bf16 %v275_v13, %v267_v50  ;;  %v277_v57 = vmul.f32 %v495_v54, %v588_v37 }
 0x104   :  { %305 = vmatprep.subr.bf16.mxu0 %v294_v53  ;;  %v497_v22 = vpop.eup %496  ;;  %508 = vrcp.f32 %v255_v14 }
 0x105   :  { %346 = vmatprep.subr.bf16.mxu1 %v296_v55  ;;  %306 = vmatpush1.bf16.msra.mxu0 %v293_v46  ;;  %v499_v17 = vpop.eup %498  ;;  %v285_v29 = vmul.f32 %v497_v22, %v599_v44 }
 0x106   :  { %347 = vmatpush1.bf16.msra.mxu1 %v295_v52  ;;  %v501_v18 = vpop.eup %500  ;;  %v258_v30 = vadd.f32 1.0, %v499_v17 }
 0x107   :  { %v503_v58 = vpop.eup %502  ;;  %v297_v59 = vpack.c.bf16 %v285_v29, %v277_v57  ;;  %v257_v60 = vadd.f32 1.0, %v501_v18 }
 0x108   :  { %510 = vrcp.f32 %v258_v30  ;;  %v259_v61 = vadd.f32 1.0, %v503_v58 }
 0x109   :  { %512 = vrcp.f32 %v257_v60 }
 0x10a   :  { %514 = vrcp.f32 %v259_v61  ;;  %v505_v62 = vpop.eup %504 }
 0x10b   :  { %v507_v63 = vpop.eup %506  ;;  %v281_v2 = vmul.f32 %v505_v62, %v590_v38  ;;  %v292_v38 = vld [vmem:[%s638_s1 + $0x10] sm:$0x7]  ;;  %s517_s1 = smov 96  }
 0x10c   :  { %v279_v4 = vmul.f32 %v507_v63, %v594_v41  ;;  %v387_v26 = vunpack.c.l.bf16 %v292_v38 }
 0x10e   :  { %v509_v0 = vpop.eup %508 }
 0x10f   :  { %v283_v6 = vmul.f32 %v509_v0, %v596_v42 }
 0x112   :  { %v511_v1 = vpop.eup %510 }
 0x113   :  { %v513_v37 = vpop.eup %512  ;;  %v289_v44 = vmul.f32 %v511_v1, %v601_v45 }
 0x114   :  { %v515_v3 = vpop.eup %514  ;;  %v287_v5 = vmul.f32 %v513_v37, %v604_v49 }
 0x115   :  { %v299_v7 = vpack.c.bf16 %v289_v44, %v281_v2  ;;  %v291_v8 = vmul.f32 %v515_v3, %v606_v51 }
 0x116   :  { %v298_v9 = vpack.c.bf16 %v287_v5, %v279_v4 }
 0x117   :  { %v300_v10 = vpack.c.bf16 %v291_v8, %v283_v6 }
 0x118   :  { %307 = vmatprep.subr.bf16.mxu0 %v298_v9 }
 0x119   :  { %348 = vmatprep.subr.bf16.mxu1 %v300_v10  ;;  %308 = vmatpush1.bf16.msra.mxu0 %v297_v59 }
 0x11a   :  { %349 = vmatpush1.bf16.msra.mxu1 %v299_v7 }
 0x11c   :  { %433 = vmatmul.mubr.msk.bf16.vlgmr.msra.gmra.mrb[8].mxu0 %vm301_vm2, %v292_v38 }
 0x11d   :  { %434 = vmatmul.mubr.msk.bf16.vlgmr.msra.gmra.mrb[8].mxu1 %vm301_vm2, %v292_v38 }
 0x1ef   :  { %v339_v41 = vpop.f32.mrb[8].mxu0 }
 0x1f0   :  { %v389_v45 = vsel %vm388_vm3, %v339_v41, 0.0  ;;  %v341_v42 = vpop.f32.mrb[9].mxu0  ;;  %v380_v49 = vpop.f32.mrb[8].mxu1 }
 0x1f1   :  { %v390_v11 = vsel %vm388_vm3, %v341_v42, 0.0  ;;  %v343_v51 = vpop.f32.mrb[10].mxu0  ;;  %v401_v12 = vsel %vm388_vm3, %v380_v49, 0.0  ;;  %v382_v15 = vpop.f32.mrb[9].mxu1 }
 0x1f2   :  { %v344_v16 = vpop.f32.mrb[11].mxu0  ;;  %v402_v19 = vsel %vm388_vm3, %v382_v15, 0.0  ;;  %v384_v20 = vpop.f32.mrb[10].mxu1  ;;  %v391_v23 = vadd.f32 %v390_v11, %v389_v45 }
 0x1f3   :  { %v385_v24 = vpop.f32.mrb[11].mxu1  ;;  %v403_v25 = vadd.f32 %v402_v19, %v401_v12 }
 0x1f4   :  { %392 = vadd.xlane.f32.xlu0 %v391_v23 }
 0x1f8   :  { %404 = vadd.xlane.f32.xlu0 %v403_v25 }
 0x281   :  { %v393_v27 = vpop.xlane.xlu0 %392 }
 0x282   :  { %v394_v28 = vadd.f32 %v393_v27, %v387_v26 }
 0x284   :  { %396 = vrot.lane.b32.xlu1 %v394_v28, %s517_s1 }
 0x285   :  { %v405_v31 = vpop.xlane.xlu0 %404 }
 0x286   :  { %v406_v32 = vadd.f32 %v405_v31, %v387_v26 }
 0x288   :  { %408 = vrot.lane.b32.xlu1 %v406_v32, %s518_s30 }
 0x2f6   :  { %v397_v33 = vpop.permute.xlu1 %396 }
 0x2f7   :  { %400 = vst.msk [vmem:[%s639_s2] sm:$0x1f] %vm399_vm4, %v397_v33 }
 0x2fa   :  { %v409_v34 = vpop.permute.xlu1 %408 }
 0x2fb   :  { %412 = vst.msk [vmem:[%s639_s2] sm:$0x1f] %vm411_vm5, %v409_v34 }

</bundles_post_ra>
